<compile_context>
chip_gen: v7x
topology: tpu7x:2x2x1
jax: 0.10.0
libtpu: 0.0.40
codegen_flags: <defaults>
</compile_context>

<pallas_src>
import functools

import jax
import jax.numpy as jnp
from jax.experimental import pallas as pl
from jax.experimental.pallas import tpu as pltpu


# ----------------------------------------------------------------------------
# small padding helpers
# ----------------------------------------------------------------------------
def _rup(x, m):
    return ((x + m - 1) // m) * m


def _pad2(a, rows, cols):
    return jnp.pad(a, ((0, rows - a.shape[0]), (0, cols - a.shape[1])))


# ----------------------------------------------------------------------------
# Pallas kernel: fused matmul (the conv / conv-transpose hot path)
#   A-load :  a   = pre_act( A * pre_scale_K + pre_shift_K )        (deferred producer BN)
#   MXU    :  acc = a @ B   (bf16 operands, f32 accumulation)
#   epilog :  O   = post_act( acc * post_scale_N + post_shift_N )   (bias / Tanh)
#             per-M-tile column stats of the raw acc: sum, sum-of-squares (BatchNorm)
# Grid (j, i, k) = (N tiles, M tiles, K tiles), k innermost. Output / stats blocks are
# indexed (i, j) only, so both i and j are megacore-parallel; stats are per-i partials
# reduced in the wrapper (no cross-grid accumulation dependency).
# ----------------------------------------------------------------------------
def _fused_matmul_kernel(a_ref, b_ref, ps_ref, pt_ref, s_ref, t_ref,
                         o_ref, sum_ref, sq_ref, acc_ref,
                         *, pre_act, post_act, n_k, tm, m_valid):
    i = pl.program_id(1)
    k = pl.program_id(2)

    # fused pre-affine (producer's deferred BatchNorm) + pre-activation on the A tile
    a = a_ref[...].astype(jnp.float32) * ps_ref[...] + pt_ref[...]
    if pre_act == "lrelu":
        a = jnp.where(a > 0, a, 0.2 * a)      # LeakyReLU(0.2)
    elif pre_act == "relu":
        a = jnp.maximum(a, 0.0)
    a = a.astype(jnp.bfloat16)

    part = jnp.dot(a, b_ref[...], preferred_element_type=jnp.float32)

    def epilogue(y):
        ys = y
        if m_valid is not None:
            # exclude zero-padded M rows (they become act(shift) != 0 under the pre-affine)
            rows = i * tm + jax.lax.broadcasted_iota(jnp.int32, (tm, 1), 0)
            ys = jnp.where(rows < m_valid, y, 0.0)
        colsum = jnp.sum(ys, axis=0, keepdims=True)           # (1, tn)
        colsq = jnp.sum(ys * ys, axis=0, keepdims=True)
        row0 = jax.lax.broadcasted_iota(jnp.int32, sum_ref.shape, 0) == 0
        sum_ref[...] = jnp.where(row0, colsum, 0.0)           # per-i-tile partial stats
        sq_ref[...] = jnp.where(row0, colsq, 0.0)
        z = y * s_ref[...] + t_ref[...]
        if post_act == "tanh":
            z = jnp.tanh(z)
        elif post_act == "relu":
            z = jnp.maximum(z, 0.0)
        elif post_act == "lrelu":
            z = jnp.where(z > 0, z, 0.2 * z)
        o_ref[...] = z.astype(o_ref.dtype)

    if n_k == 1:
        # single K tile: skip the VMEM accumulator round-trip entirely
        epilogue(part)
    else:
        @pl.when(k == 0)
        def _():
            acc_ref[...] = jnp.zeros_like(acc_ref)

        acc_ref[...] += part

        @pl.when(k == n_k - 1)
        def _():
            epilogue(acc_ref[...])


def fused_matmul(a, b, pre_scale, pre_shift, post_scale, post_shift,
                 pre_act="none", post_act="none", out_dtype=jnp.bfloat16):
    """(M,K)@(K,N) with fused per-K-column affine + pre-activation on A, per-N-column
    affine + activation epilogue, and per-N-column (sum, sum^2) stats of the raw product."""
    M, K = a.shape
    K2, N = b.shape
    assert K == K2
    # Adaptive MXU-friendly tiles (256-wide K/N matches the v6e/v7x 256x256 MXU); M padded
    # minimally (16 rows for bf16 sublane packing) so tiny inner UNet levels stay cheap.
    if M <= 1024:
        tm = _rup(M, 16)
    elif M <= 8192:
        tm = 512
    else:
        tm = 1024
    Mp = _rup(M, tm)
    tk = _rup(K, 128) if K <= 256 else 256
    Kp = _rup(K, tk)
    if N <= 256:
        tn = _rup(N, 128)
    elif N < 1024:
        tn = 256
    else:
        tn = 512
    Np = _rup(N, tn)
    n_i, n_j, n_k = Mp // tm, Np // tn, Kp // tk

    a_p = _pad2(a.astype(jnp.bfloat16), Mp, Kp)
    b_p = _pad2(b.astype(jnp.bfloat16), Kp, Np)
    ps_p = _pad2(pre_scale.reshape(1, K).astype(jnp.float32), 1, Kp)
    pt_p = _pad2(pre_shift.reshape(1, K).astype(jnp.float32), 1, Kp)
    s_p = _pad2(post_scale.reshape(1, N).astype(jnp.float32), 1, Np)
    t_p = _pad2(post_shift.reshape(1, N).astype(jnp.float32), 1, Np)

    grid = (n_j, n_i, n_k)

    out, psum, psq = pl.pallas_call(
        functools.partial(_fused_matmul_kernel, pre_act=pre_act, post_act=post_act,
                          n_k=n_k, tm=tm, m_valid=(M if Mp != M else None)),
        out_shape=(jax.ShapeDtypeStruct((Mp, Np), out_dtype),
                   jax.ShapeDtypeStruct((8 * n_i, Np), jnp.float32),
                   jax.ShapeDtypeStruct((8 * n_i, Np), jnp.float32)),
        grid_spec=pltpu.PrefetchScalarGridSpec(
            num_scalar_prefetch=0,
            grid=grid,
            in_specs=[
                pl.BlockSpec((tm, tk), lambda j, i, k: (i, k)),
                pl.BlockSpec((tk, tn), lambda j, i, k: (k, j)),
                pl.BlockSpec((1, tk), lambda j, i, k: (0, k)),
                pl.BlockSpec((1, tk), lambda j, i, k: (0, k)),
                pl.BlockSpec((1, tn), lambda j, i, k: (0, j)),
                pl.BlockSpec((1, tn), lambda j, i, k: (0, j)),
            ],
            out_specs=(
                pl.BlockSpec((tm, tn), lambda j, i, k: (i, j)),
                pl.BlockSpec((8, tn), lambda j, i, k: (i, j)),
                pl.BlockSpec((8, tn), lambda j, i, k: (i, j)),
            ),
            scratch_shapes=[pltpu.VMEM((tm, tn), jnp.float32)],
        ),
        compiler_params=pltpu.CompilerParams(
            # output / stats blocks are unique per (i, j); only k carries the accumulator,
            # so both tile axes can be split across TensorCores (v7x megacore).
            dimension_semantics=("parallel", "parallel", "arbitrary"),
            vmem_limit_bytes=32 * 1024 * 1024),
    )(a_p, b_p, ps_p, pt_p, s_p, t_p)

    csum = psum.sum(axis=0)[:N]
    csq = psq.sum(axis=0)[:N]
    return out[:M, :N], csum, csq


# ----------------------------------------------------------------------------
# layer ops built on the kernel (glue = pad / slice / reshape only, kept in bf16)
# ----------------------------------------------------------------------------
def _affine_pad(x, scale, shift):
    """Spatially pad x by 1 with the per-channel value pv = -shift/scale so that the fused
    pre-affine in the kernel maps padding to exactly act(0) == 0 (conv zero-padding semantics)."""
    N, H, W, C = x.shape
    pv = (-shift / scale).astype(x.dtype).reshape(1, 1, 1, C)
    xz = jnp.pad(x, ((0, 0), (1, 1), (1, 1), (0, 0)))
    interior = jnp.pad(jnp.ones((1, H, W, 1), jnp.bool_), ((0, 0), (1, 1), (1, 1), (0, 0)))
    return jnp.where(interior, xz, pv)


def conv_down(x, w, scale, shift, pre_act="lrelu", out_dtype=jnp.bfloat16):
    """Conv2d(kernel=4, stride=2, pad=1, bias=False) of act(x*scale + shift).
    x:(N,H,W,Cin) raw bf16, w:(4,4,Cin,Cout). Returns (y_raw, ch_sum, ch_sq)."""
    # TODO(synk): im2col patches are still materialized by XLA glue; forming them in-kernel
    # (strided DMA of the padded NHWC input) would cut A-operand HBM traffic 16x.
    N, H, W, Cin = x.shape
    Cout = w.shape[-1]
    Ho, Wo = H // 2, W // 2
    xp = _affine_pad(x, scale, shift)
    patches = [xp[:, ky:ky + 2 * Ho:2, kx:kx + 2 * Wo:2, :]
               for ky in range(4) for kx in range(4)]
    pmat = jnp.stack(patches, axis=3).reshape(N * Ho * Wo, 16 * Cin)
    ps = jnp.tile(scale.astype(jnp.float32), 16)
    pt = jnp.tile(shift.astype(jnp.float32), 16)
    ones = jnp.ones((Cout,), jnp.float32)
    zeros = jnp.zeros((Cout,), jnp.float32)
    y, s, sq = fused_matmul(pmat, w.reshape(16 * Cin, Cout), ps, pt, ones, zeros,
                            pre_act=pre_act, post_act="none", out_dtype=out_dtype)
    return y.reshape(N, Ho, Wo, Cout), s, sq


def _upconv_phase_weight(w):
    """(Cin,4,4,Cout) ConvTranspose weight -> (9*Cin, 4*Cout) gather-form weight.
    K index = (dy,dx,ci) over the 3x3 input neighbourhood; N index = (r,s,co) over the 2x2
    output phase: out[2*iy+r, 2*ix+s] = sum_{dy,dx,ci} x[iy+dy-1, ix+dx-1, ci] * Wb[...]."""
    Cin, _, _, Cout = w.shape
    wb = jnp.zeros((3, 3, Cin, 2, 2, Cout), w.dtype)
    for d in range(3):              # dy = d - 1
        for r in range(2):
            ky = r - 2 * (d - 1) + 1
            if not 0 <= ky <= 3:
                continue
            for e in range(3):      # dx = e - 1
                for s in range(2):
                    kx = s - 2 * (e - 1) + 1
                    if not 0 <= kx <= 3:
                        continue
                    wb = wb.at[d, e, :, r, s, :].set(w[:, ky, kx, :])
    return wb.reshape(9 * Cin, 4 * Cout)


def conv_up(x, wb, scale, shift, pre_act="relu", bias=None, post_act="none",
            out_dtype=jnp.bfloat16):
    """ConvTranspose2d(kernel=4, stride=2, pad=1) of act(x*scale + shift).
    x:(N,H,W,Cin) raw bf16, wb: precomputed gather-form weight (9*Cin, 4*Cout).
    Output entries of the matmul ARE the ConvT outputs (no col2im scatter)."""
    N, H, W, Cin = x.shape
    Cout = wb.shape[-1] // 4
    xp = _affine_pad(x, scale, shift)
    patches = [xp[:, dy:dy + H, dx:dx + W, :] for dy in range(3) for dx in range(3)]
    pmat = jnp.stack(patches, axis=3).reshape(N * H * W, 9 * Cin)
    ps = jnp.tile(scale.astype(jnp.float32), 9)
    pt = jnp.tile(shift.astype(jnp.float32), 9)
    post_s = jnp.ones((4 * Cout,), jnp.float32)
    post_t = (jnp.zeros((4 * Cout,), jnp.float32) if bias is None
              else jnp.tile(bias.astype(jnp.float32), 4))
    y, s, sq = fused_matmul(pmat, wb, ps, pt, post_s, post_t,
                            pre_act=pre_act, post_act=post_act, out_dtype=out_dtype)
    # TODO(synk): this 2x2 phase interleave is still a full-tensor shuffle; folding it into the
    # consumer's gather (phase-planar layout) would remove one read+write of the up activations.
    y = y.reshape(N, H, W, 2, 2, Cout).transpose(0, 1, 3, 2, 4, 5)
    y = y.reshape(N, 2 * H, 2 * W, Cout)
    ch_sum = s.reshape(2, 2, Cout).sum(axis=(0, 1))
    ch_sq = sq.reshape(2, 2, Cout).sum(axis=(0, 1))
    return y, ch_sum, ch_sq


def _bn_scale_shift(gamma, beta, ch_sum, ch_sq, count, eps=1e-5):
    # training-mode BatchNorm2d: biased batch statistics over (N, H, W)
    mean = ch_sum / count
    var = jnp.maximum(ch_sq / count - mean * mean, 0.0)  # clamp: E[x^2]-mean^2 cancellation
    scale = gamma * jax.lax.rsqrt(var + eps)
    shift = beta - mean * scale
    return scale, shift


# ----------------------------------------------------------------------------
# UnetBlock / Unet: deterministic parameter construction + forward
# Activations flow between blocks as (raw bf16 conv output, per-channel scale, shift);
# the deferred BatchNorm affine is applied inside the consumer conv's A-operand load.
# ----------------------------------------------------------------------------
def make_block_params(key, nf, ni, submodule=None, input_c=None, dropout=False,
                      innermost=False, outermost=False):
    if input_c is None:
        input_c = nf
    k1, k2, k3 = jax.random.split(key, 3)
    p = {"outermost": outermost, "innermost": innermost, "dropout": dropout,
         "submodule": submodule}
    # downconv: Conv2d(input_c, ni, 4, 2, 1, bias=False); weight stored (kh, kw, Cin, Cout)
    p["down_w"] = 0.02 * jax.random.normal(k1, (4, 4, input_c, ni), jnp.float32)
    if (not outermost) and (not innermost):
        p["down_gamma"] = jnp.ones((ni,), jnp.float32)
        p["down_beta"] = jnp.zeros((ni,), jnp.float32)
    up_in = ni if innermost else ni * 2
    # upconv: ConvTranspose2d(up_in, nf, 4, 2, 1); gather-form weight precomputed ONCE here
    up_w = 0.02 * jax.random.normal(k2, (up_in, 4, 4, nf), jnp.float32)
    p["up_wb"] = _upconv_phase_weight(up_w)
    if outermost:
        p["up_b"] = 0.02 * jax.random.normal(k3, (nf,), jnp.float32)
    else:
        p["up_gamma"] = jnp.ones((nf,), jnp.float32)
        p["up_beta"] = jnp.zeros((nf,), jnp.float32)
    return p


def block_forward(p, x, x_scale, x_shift):
    """x: raw bf16 NHWC; logical block input = x * x_scale + x_shift (deferred producer BN).
    Returns the final tensor (outermost) or (raw, scale, shift) with the up BN deferred."""
    N, H, W, _ = x.shape
    pre = "none" if p["outermost"] else "lrelu"           # LeakyReLU(0.2) fused into the conv
    h, dsum, dsq = conv_down(x, p["down_w"], x_scale, x_shift, pre_act=pre)
    Cd = h.shape[-1]
    if (not p["outermost"]) and (not p["innermost"]):
        cnt = jnp.float32(N * (H // 2) * (W // 2))
        h_scale, h_shift = _bn_scale_shift(p["down_gamma"], p["down_beta"], dsum, dsq, cnt)
    else:
        h_scale = jnp.ones((Cd,), jnp.float32)
        h_shift = jnp.zeros((Cd,), jnp.float32)

    if p["submodule"] is not None:
        s_raw, s_scale, s_shift = block_forward(p["submodule"], h, h_scale, h_shift)
    else:
        s_raw, s_scale, s_shift = h, h_scale, h_shift

    if p["outermost"]:
        # ReLU + deferred BN fused as matmul pre-affine; bias + Tanh fused in the epilogue.
        out, _, _ = conv_up(s_raw, p["up_wb"], s_scale, s_shift, pre_act="relu",
                            bias=p["up_b"], post_act="tanh", out_dtype=jnp.float32)
        return out

    up, usum, usq = conv_up(s_raw, p["up_wb"], s_scale, s_shift, pre_act="relu")
    cnt = jnp.float32(N * up.shape[1] * up.shape[2])
    u_scale, u_shift = _bn_scale_shift(p["up_gamma"], p["up_beta"], usum, usq, cnt)
    # TODO(synk): nn.Dropout(0.5) is stochastic in training mode; applied as identity (eval).
    # TODO(synk): the skip concat still materializes one bf16 copy per level; a split-K
    # two-operand matmul in the consumer would remove it.
    cat = jnp.concatenate([x, up], axis=-1)
    return cat, jnp.concatenate([x_scale, u_scale]), jnp.concatenate([x_shift, u_shift])


def make_unet_params(key, input_c=1, output_c=2, n_down=5, num_filters=8):
    keys = list(jax.random.split(key, n_down + 2))
    ki = iter(keys)
    block = make_block_params(next(ki), num_filters * 8, num_filters * 8, innermost=True)
    for _ in range(n_down - 5):
        block = make_block_params(next(ki), num_filters * 8, num_filters * 8,
                                  submodule=block, dropout=True)
    out_filters = num_filters * 8
    for _ in range(3):
        block = make_block_params(next(ki), out_filters // 2, out_filters, submodule=block)
        out_filters //= 2
    return make_block_params(next(ki), output_c, out_filters, input_c=input_c,
                             submodule=block, outermost=True)


def unet_forward(params, x_nchw):
    x = jnp.transpose(x_nchw, (0, 2, 3, 1)).astype(jnp.bfloat16)  # NCHW -> NHWC, bf16 activations
    c = x.shape[-1]
    ident_s = jnp.ones((c,), jnp.float32)
    ident_t = jnp.zeros((c,), jnp.float32)
    y = block_forward(params, x, ident_s, ident_t)
    return jnp.transpose(y, (0, 3, 1, 2)).astype(jnp.float32)     # NHWC -> NCHW


# ----------------------------------------------------------------------------
if __name__ == "__main__":
    key = jax.random.PRNGKey(0)
    pkey, xkey, ckey = jax.random.split(key, 3)

    # --- numerical self-check of the fused conv kernels against lax references ---
    k1, k2, k3, k4, k5 = jax.random.split(ckey, 5)
    cx = jax.random.normal(k1, (1, 4, 4, 16), jnp.float32).astype(jnp.bfloat16).astype(jnp.float32)
    wd = (0.02 * jax.random.normal(k2, (4, 4, 16, 8), jnp.float32)
          ).astype(jnp.bfloat16).astype(jnp.float32)
    wu = (0.02 * jax.random.normal(k3, (16, 4, 4, 8), jnp.float32)
          ).astype(jnp.bfloat16).astype(jnp.float32)
    one16 = jnp.ones((16,), jnp.float32)
    zero16 = jnp.zeros((16,), jnp.float32)

    # strided conv, identity deferred affine
    yd, _, _ = conv_down(cx, wd, one16, zero16, pre_act="none", out_dtype=jnp.float32)
    ref_d = jax.lax.conv_general_dilated(
        cx, wd, window_strides=(2, 2), padding=((1, 1), (1, 1)),
        dimension_numbers=("NHWC", "HWIO", "NHWC"))
    assert bool(jnp.allclose(yd, ref_d, atol=1e-2, rtol=1e-2)), \
        float(jnp.max(jnp.abs(yd - ref_d)))

    # strided conv with fused BN affine + LeakyReLU pre-activation (checks pad-value handling)
    sc = jnp.exp(0.25 * jax.random.normal(k4, (16,), jnp.float32))
    sh = 0.5 * jax.random.normal(k5, (16,), jnp.float32)
    yd2, _, _ = conv_down(cx, wd, sc, sh, pre_act="lrelu", out_dtype=jnp.float32)
    xa = cx * sc + sh
    xa = jnp.where(xa > 0, xa, 0.2 * xa)
    ref_d2 = jax.lax.conv_general_dilated(
        xa, wd, window_strides=(2, 2), padding=((1, 1), (1, 1)),
        dimension_numbers=("NHWC", "HWIO", "NHWC"))
    assert bool(jnp.allclose(yd2, ref_d2, atol=1e-2, rtol=1e-2)), \
        float(jnp.max(jnp.abs(yd2 - ref_d2)))

    # transpose conv (gather form, precomputed phase weight), identity deferred affine
    wub = _upconv_phase_weight(wu)
    yu, _, _ = conv_up(cx, wub, one16, zero16, pre_act="none", out_dtype=jnp.float32)
    wu_ref = jnp.transpose(wu[:, ::-1, ::-1, :], (1, 2, 0, 3))  # ConvT == dilated conv, flipped
    ref_u = jax.lax.conv_general_dilated(
        cx, wu_ref, window_strides=(1, 1), padding=((2, 2), (2, 2)),
        lhs_dilation=(2, 2), dimension_numbers=("NHWC", "HWIO", "NHWC"))
    assert bool(jnp.allclose(yu, ref_u, atol=1e-2, rtol=1e-2)), \
        float(jnp.max(jnp.abs(yu - ref_u)))

    # --- full UNet forward ---
    # small config consistent with the module: n_down=5 levels, base filters 8,
    # input 1 channel / output 2 channels, 32x32 spatial (needs >= 2^n_down).
    params = make_unet_params(pkey, input_c=1, output_c=2, n_down=5, num_filters=8)
    x = jax.random.normal(xkey, (2, 1, 32, 32), jnp.float32)

    fwd = jax.jit(lambda inp: unet_forward(params, inp))
    y = jax.block_until_ready(fwd(x))

    assert y.shape == (2, 2, 32, 32), y.shape
    assert bool(jnp.all(jnp.isfinite(y)))
    assert bool(jnp.all(jnp.abs(y) <= 1.0 + 1e-6))  # Tanh output range
    print("KERNEL_OK")
</pallas_src>

<mosaic_0001>
module attributes {stable_mosaic.version = 11 : i64} {
  func.func @_fused_matmul_kernel(%arg0: i32, %arg1: i32, %arg2: i32, %arg3: memref<16x256xbf16, #tpu.memory_space<vmem>>, %arg4: memref<256x128xbf16, #tpu.memory_space<vmem>>, %arg5: memref<1x256xf32, #tpu.memory_space<vmem>>, %arg6: memref<1x256xf32, #tpu.memory_space<vmem>>, %arg7: memref<1x128xf32, #tpu.memory_space<vmem>>, %arg8: memref<1x128xf32, #tpu.memory_space<vmem>>, %arg9: memref<16x128xf32, #tpu.memory_space<vmem>>, %arg10: memref<8x128xf32, #tpu.memory_space<vmem>>, %arg11: memref<8x128xf32, #tpu.memory_space<vmem>>, %arg12: memref<16x128xf32, #tpu.memory_space<vmem>>) attributes {dimension_semantics = [#tpu.dimension_semantics<parallel>, #tpu.dimension_semantics<parallel>, #tpu.dimension_semantics<arbitrary>], iteration_bounds = array<i64: 1, 1, 1>, scalar_prefetch = 0 : i64, scratch_operands = 1 : i64, tpu.core_type = #tpu.core_type<tc>, window_params = [{transform_indices = @transform_0, window_bounds = array<i64: 16, 256>}, {transform_indices = @transform_1, window_bounds = array<i64: 256, 128>}, {transform_indices = @transform_2, window_bounds = array<i64: 1, 256>}, {transform_indices = @transform_3, window_bounds = array<i64: 1, 256>}, {transform_indices = @transform_4, window_bounds = array<i64: 1, 128>}, {transform_indices = @transform_5, window_bounds = array<i64: 1, 128>}, {transform_indices = @transform_6, window_bounds = array<i64: 16, 128>}, {transform_indices = @transform_7, window_bounds = array<i64: 8, 128>}, {transform_indices = @transform_8, window_bounds = array<i64: 8, 128>}]} {
    %c0 = arith.constant 0 : index
    %c0_0 = arith.constant 0 : index
    %0 = vector.load %arg3[%c0, %c0_0] : memref<16x256xbf16, #tpu.memory_space<vmem>>, vector<16x256xbf16>
    %1 = arith.extf %0 : vector<16x256xbf16> to vector<16x256xf32>
    %c0_1 = arith.constant 0 : index
    %c0_2 = arith.constant 0 : index
    %2 = vector.load %arg5[%c0_1, %c0_2] : memref<1x256xf32, #tpu.memory_space<vmem>>, vector<1x256xf32>
    %3 = vector.broadcast %2 : vector<1x256xf32> to vector<16x256xf32>
    %4 = arith.mulf %1, %3 : vector<16x256xf32>
    %c0_3 = arith.constant 0 : index
    %c0_4 = arith.constant 0 : index
    %5 = vector.load %arg6[%c0_3, %c0_4] : memref<1x256xf32, #tpu.memory_space<vmem>>, vector<1x256xf32>
    %6 = vector.broadcast %5 : vector<1x256xf32> to vector<16x256xf32>
    %7 = arith.addf %4, %6 : vector<16x256xf32>
    %8 = arith.truncf %7 : vector<16x256xf32> to vector<16x256xbf16>
    %c0_5 = arith.constant 0 : index
    %c0_6 = arith.constant 0 : index
    %9 = vector.load %arg4[%c0_5, %c0_6] : memref<256x128xbf16, #tpu.memory_space<vmem>>, vector<256x128xbf16>
    %cst = arith.constant dense<0.000000e+00> : vector<16x128xf32>
    %10 = tpu.matmul %8, %9, %cst {dimension_numbers = #tpu.dot_dimension_numbers<[1], [0], [0], [1], [0, 0, 1, 1], [], []>} : vector<16x256xbf16>, vector<256x128xbf16>, vector<16x128xf32> -> vector<16x128xf32>
    %c16_i32 = arith.constant 16 : i32
    %11 = arith.muli %arg1, %c16_i32 : i32
    %12 = tpu.iota {dimensions = array<i32: 0>} : vector<16x1xi32>
    %13 = vector.broadcast %11 : i32 to vector<16x1xi32>
    %14 = arith.addi %13, %12 : vector<16x1xi32>
    %c4_i32 = arith.constant 4 : i32
    %15 = vector.broadcast %c4_i32 : i32 to vector<16x1xi32>
    %16 = arith.cmpi slt, %14, %15 : vector<16x1xi32>
    %cst_7 = arith.constant 0.000000e+00 : f32
    %17 = vector.shape_cast %16 : vector<16x1xi1> to vector<16x1xi1>
    %18 = vector.broadcast %17 : vector<16x1xi1> to vector<16x128xi1>
    %19 = vector.broadcast %cst_7 : f32 to vector<16x128xf32>
    %20 = arith.select %18, %10, %19 : vector<16x128xi1>, vector<16x128xf32>
    %cst_8 = arith.constant dense<0.000000e+00> : vector<128xf32>
    %21 = vector.multi_reduction <add>, %20, %cst_8 [0] : vector<16x128xf32> to vector<128xf32>
    %22 = vector.shape_cast %21 : vector<128xf32> to vector<1x128xf32>
    %23 = arith.mulf %20, %20 : vector<16x128xf32>
    %cst_9 = arith.constant dense<0.000000e+00> : vector<128xf32>
    %24 = vector.multi_reduction <add>, %23, %cst_9 [0] : vector<16x128xf32> to vector<128xf32>
    %25 = vector.shape_cast %24 : vector<128xf32> to vector<1x128xf32>
    %26 = tpu.iota {dimensions = array<i32: 0>} : vector<8x128xi32>
    %c0_i32 = arith.constant 0 : i32
    %27 = vector.broadcast %c0_i32 : i32 to vector<8x128xi32>
    %28 = arith.cmpi eq, %26, %27 : vector<8x128xi32>
    %cst_10 = arith.constant 0.000000e+00 : f32
    %29 = vector.shape_cast %22 : vector<1x128xf32> to vector<1x128xf32>
    %30 = vector.broadcast %29 : vector<1x128xf32> to vector<8x128xf32>
    %31 = vector.broadcast %cst_10 : f32 to vector<8x128xf32>
    %32 = arith.select %28, %30, %31 : vector<8x128xi1>, vector<8x128xf32>
    %c0_11 = arith.constant 0 : index
    %c0_12 = arith.constant 0 : index
    %33 = vector.load %arg10[%c0_11, %c0_12] : memref<8x128xf32, #tpu.memory_space<vmem>>, vector<8x128xf32>
    tpu.vector_store %arg10[%c0_11, %c0_12], %32 {strides = array<i32>} : memref<8x128xf32, #tpu.memory_space<vmem>>, vector<8x128xf32>,
    %cst_13 = arith.constant 0.000000e+00 : f32
    %34 = vector.shape_cast %25 : vector<1x128xf32> to vector<1x128xf32>
    %35 = vector.broadcast %34 : vector<1x128xf32> to vector<8x128xf32>
    %36 = vector.broadcast %cst_13 : f32 to vector<8x128xf32>
    %37 = arith.select %28, %35, %36 : vector<8x128xi1>, vector<8x128xf32>
    %c0_14 = arith.constant 0 : index
    %c0_15 = arith.constant 0 : index
    %38 = vector.load %arg11[%c0_14, %c0_15] : memref<8x128xf32, #tpu.memory_space<vmem>>, vector<8x128xf32>
    tpu.vector_store %arg11[%c0_14, %c0_15], %37 {strides = array<i32>} : memref<8x128xf32, #tpu.memory_space<vmem>>, vector<8x128xf32>,
    %c0_16 = arith.constant 0 : index
    %c0_17 = arith.constant 0 : index
    %39 = vector.load %arg7[%c0_16, %c0_17] : memref<1x128xf32, #tpu.memory_space<vmem>>, vector<1x128xf32>
    %40 = vector.broadcast %39 : vector<1x128xf32> to vector<16x128xf32>
    %41 = arith.mulf %10, %40 : vector<16x128xf32>
    %c0_18 = arith.constant 0 : index
    %c0_19 = arith.constant 0 : index
    %42 = vector.load %arg8[%c0_18, %c0_19] : memref<1x128xf32, #tpu.memory_space<vmem>>, vector<1x128xf32>
    %43 = vector.broadcast %42 : vector<1x128xf32> to vector<16x128xf32>
    %44 = arith.addf %41, %43 : vector<16x128xf32>
    %c0_20 = arith.constant 0 : index
    %c0_21 = arith.constant 0 : index
    %45 = vector.load %arg9[%c0_20, %c0_21] : memref<16x128xf32, #tpu.memory_space<vmem>>, vector<16x128xf32>
    tpu.vector_store %arg9[%c0_20, %c0_21], %44 {strides = array<i32>} : memref<16x128xf32, #tpu.memory_space<vmem>>, vector<16x128xf32>,
    return
  }
  func.func @transform_0(%arg0: i32, %arg1: i32, %arg2: i32) -> (i32, i32) {
    %c0_i32 = arith.constant 0 : i32
    return %arg1, %arg2 : i32, i32
  }
  func.func @transform_1(%arg0: i32, %arg1: i32, %arg2: i32) -> (i32, i32) {
    %c0_i32 = arith.constant 0 : i32
    return %arg2, %arg0 : i32, i32
  }
  func.func @transform_2(%arg0: i32, %arg1: i32, %arg2: i32) -> (i32, i32) {
    %c0_i32 = arith.constant 0 : i32
    %c0_i32_0 = arith.constant 0 : i32
    return %c0_i32, %arg2 : i32, i32
  }
  func.func @transform_3(%arg0: i32, %arg1: i32, %arg2: i32) -> (i32, i32) {
    %c0_i32 = arith.constant 0 : i32
    %c0_i32_0 = arith.constant 0 : i32
    return %c0_i32, %arg2 : i32, i32
  }
  func.func @transform_4(%arg0: i32, %arg1: i32, %arg2: i32) -> (i32, i32) {
    %c0_i32 = arith.constant 0 : i32
    %c0_i32_0 = arith.constant 0 : i32
    return %c0_i32, %arg0 : i32, i32
  }
  func.func @transform_5(%arg0: i32, %arg1: i32, %arg2: i32) -> (i32, i32) {
    %c0_i32 = arith.constant 0 : i32
    %c0_i32_0 = arith.constant 0 : i32
    return %c0_i32, %arg0 : i32, i32
  }
  func.func @transform_6(%arg0: i32, %arg1: i32, %arg2: i32) -> (i32, i32) {
    %c0_i32 = arith.constant 0 : i32
    return %arg1, %arg0 : i32, i32
  }
  func.func @transform_7(%arg0: i32, %arg1: i32, %arg2: i32) -> (i32, i32) {
    %c0_i32 = arith.constant 0 : i32
    return %arg1, %arg0 : i32, i32
  }
  func.func @transform_8(%arg0: i32, %arg1: i32, %arg2: i32) -> (i32, i32) {
    %c0_i32 = arith.constant 0 : i32
    return %arg1, %arg0 : i32, i32
  }
}

</mosaic_0001>

<bundles_post_ra>
// kernel: tpu_custom_call.1
= control target key start
LH: loop header
LB: loop body
LE: loop exit
PB: predicated region body
PF: predicated region fallthrough
CT: control target
= control target key end

     0   :  { %14 = vsyncpa [#allocation4], 0  ;;  %s692_s0 = inlined_call_operand.hbm [shape: bf16[16,256], index: 0, kind: input, shape index: {}]   ;;  %s693_s1 = inlined_call_operand.hbm [shape: bf16[256,128], index: 1, kind: input, shape index: {}]   ;;  %s694_s2 = inlined_call_operand.vmem [shape: f32[1,256], index: 2, kind: input, shape index: {}]   ;;  %s695_s3 = inlined_call_operand.vmem [shape: f32[1,256], index: 3, kind: input, shape index: {}]   ;;  %s696_s4 = inlined_call_operand.vmem [shape: f32[1,128], index: 4, kind: input, shape index: {}]   ;;  %s697_s5 = inlined_call_operand.vmem [shape: f32[1,128], index: 5, kind: input, shape index: {}]   ;;  %s698_s6 = inlined_call_operand.hbm [shape: f32[16,128], index: 6, kind: output, shape index: {0}]   ;;  %s699_s7 = inlined_call_operand.hbm [shape: f32[8,128], index: 7, kind: output, shape index: {1}]   ;;  %s700_s8 = inlined_call_operand.hbm [shape: f32[8,128], index: 8, kind: output, shape index: {2}]  }
   0x1   :  { %15 = vsyncpa [#allocation7], 0 }
   0x2   :  { %16 = vsyncpa [#allocation5], 0 }
   0x3   :  { %17 = vsyncpa [#allocation10], 0  ;;  %s550_s27 = smov [#allocation3]   ;;  %s432_s9 = scalar_lea.hbm %s692_s0, 256 }
   0x4   :  { %s23_s28 = sshll.u32 %s550_s27, 4  ;;  %p433_p0 = scmp.ne.s32.totalorder %s692_s0, %s432_s9  ;;  %s24_s28 = int_to_ptr.vmem [resolvable:$true] %s23_s28 }
   0x5   :  { %p436_p1 = scmp.lt.u32.totalorder %s432_s9, %s692_s0 }
   0x7   :  { %p438_p2 = pnand %p436_p1, %p433_p0 }
   0x9   :  { %441 = shalt.err (!%p438_p2)
}
   0xa   :  { %s442_s14 = scalar_lea.vmem %s24_s28, 256  ;;  %p447_p4 = scmp.lt.s32.totalorder %s24_s28, %s24_s28 }
   0xb   :  { %p443_p3 = scmp.ne.s32.totalorder %s24_s28, %s442_s14  ;;  %p448_p5 = scmp.lt.s32.totalorder %s442_s14, %s442_s14 }
   0xd   :  { %p449_p6 = por %p448_p5, %p447_p4 }
   0xf   :  { %p450_p7 = pnand %p449_p6, %p443_p3 }
  0x11   :  { %453 = shalt.err (!%p450_p7)
}
  0x12   :  { %s551_s15 = smov 128   ;;  %s552_s16 = smov 8  }
  0x13   :  { %29 = dma.hbm_to_vmem [thread:$0]  %s692_s0, 256, %s24_s28, [#allocation4], %s551_s15, %s551_s15, %s552_s16  }
  0x14   :  { %s553_s19 = smov [#allocation6]   ;;  %s454_s23 = scalar_lea.hbm %s693_s1, 2048 }
  0x15   :  { %s35_s20 = sshll.u32 %s553_s19, 4  ;;  %p455_p8 = scmp.ne.s32.totalorder %s693_s1, %s454_s23  ;;  %s36_s20 = int_to_ptr.vmem [resolvable:$true] %s35_s20 }
  0x16   :  { %p458_p9 = scmp.lt.u32.totalorder %s454_s23, %s693_s1 }
  0x18   :  { %p460_p10 = pnand %p458_p9, %p455_p8 }
  0x1a   :  { %463 = shalt.err (!%p460_p10)
}
  0x1b   :  { %s464_s29 = scalar_lea.vmem %s36_s20, 2048  ;;  %p469_p12 = scmp.lt.s32.totalorder %s36_s20, %s36_s20 }
  0x1c   :  { %p465_p11 = scmp.ne.s32.totalorder %s36_s20, %s464_s29  ;;  %p470_p13 = scmp.lt.s32.totalorder %s464_s29, %s464_s29 }
  0x1e   :  { %p471_p0 = por %p470_p13, %p469_p12 }
  0x20   :  { %p472_p1 = pnand %p471_p0, %p465_p11 }
  0x22   :  { %475 = shalt.err (!%p472_p1)
}
  0x23   :  { %s554_s0 = smov 64   ;;  %s555_s28 = smov 4  }
  0x24   :  { %41 = dma.hbm_to_vmem [thread:$0]  %s693_s1, 2048, %s36_s20, [#allocation7], %s554_s0, %s554_s0, %s555_s28  }
  0x25   :  { %542 = dma.done.wait [#allocation4], 256  }
  0x26   :  { %543 = vsyncadd [#allocation4], 4294967040 }
  0x27   :  { %544 = dma.done.wait [#allocation7], 2048  }
  0x28   :  { %545 = vsyncadd [#allocation7], 4294965248  ;;  %v416_v0 = vld [vmem:[#allocation6 + $0x40] sm:$0xff]   ;;  %v418_v2 = vld [vmem:[#allocation6 + $0x48] sm:$0xff]   ;;  %v65_v5 = vlaneseq  ;;  %s556_s17 = smov [#allocation8]  }
  0x29   :  { %v417_v1 = vld [vmem:[#allocation6] sm:$0xff]   ;;  %385 = vmatprep.subr.bf16.mxu0 %v416_v0  ;;  %v419_v3 = vld [vmem:[#allocation6 + $0x8] sm:$0xff]   ;;  %v420_v4 = vld [vmem:[#allocation6 + $0x50] sm:$0xff]   ;;  %s327_s18 = sshll.u32 %s556_s17, 4  ;;  %s328_s18 = int_to_ptr.vmem [resolvable:$true] %s327_s18 }
  0x2a   :  { %386 = vmatpush3.bf16.msra.mxu0 %v417_v1  ;;  %v421_v6 = vld [vmem:[#allocation6 + $0x10] sm:$0xff]   ;;  %v422_v7 = vld [vmem:[#allocation6 + $0x58] sm:$0xff]   ;;  %v631_v8 = vshrl.u32 %v65_v5, 7  ;;  %v424_v10 = vld [vmem:[#allocation6 + $0x60] sm:$0xff]   ;;  %p481_p3 = scmp.lt.s32.totalorder %s328_s18, %s328_s18 }
  0x2b   :  { %387 = vmatprep.subr.bf16.mxu0 %v418_v2  ;;  %v423_v9 = vld [vmem:[#allocation6 + $0x18] sm:$0xff]   ;;  %v425_v12 = vld [vmem:[#allocation6 + $0x20] sm:$0xff]   ;;  %v426_v14 = vld [vmem:[#allocation6 + $0x68] sm:$0xff]  }
  0x2c   :  { %v67_v11 = vsub.s32 0, %v631_v8  ;;  %v71_v13 = vsub.s32 1, %v631_v8  ;;  %v57_v15 = vld [vmem:[#allocation3] sm:$0xff]  ;;  %v58_v16 = vld [vmem:[#allocation3 + $0x8] sm:$0xff]  ;;  %v427_v26 = vld [vmem:[#allocation6 + $0x28] sm:$0xff]   ;;  %vm273_vm0 = vcmp.lt.s32.totalorder %v631_v8, 4 }
  0x2d   :  { %v63_v17 = vld [vmem:[%s694_s2] sm:$0x3]  ;;  %v59_v18 = vunpack.c.l.bf16 %v57_v15  ;;  %v60_v19 = vunpack.c.h.bf16 %v57_v15  ;;  %v62_v20 = vunpack.c.h.bf16 %v58_v16  ;;  %v61_v22 = vunpack.c.l.bf16 %v58_v16  ;;  %v430_v36 = vld [vmem:[#allocation6 + $0x78] sm:$0xff]  }
  0x2e   :  { %388 = vmatpush3.bf16.msra.mxu0 %v419_v3  ;;  %v79_v21 = vld [vmem:[%s695_s3] sm:$0x3]  ;;  %v68_v23 = vrot.slane %v63_v17, %v67_v11  ;;  %v72_v24 = vrot.slane %v63_v17, %v71_v13  ;;  %v431_v40 = vld [vmem:[#allocation6 + $0x38] sm:$0xff]  }
  0x2f   :  { %389 = vmatprep.subr.bf16.mxu0 %v420_v4  ;;  %v88_v25 = vrot.slane %v79_v21, %v71_v13  ;;  %v428_v27 = vld [vmem:[#allocation6 + $0x70] sm:$0xff]   ;;  %v84_v30 = vrot.slane %v79_v21, %v67_v11 }
  0x30   :  { %v76_v28 = vmul.f32 %v72_v24, %v60_v19  ;;  %v78_v29 = vmul.f32 %v72_v24, %v62_v20  ;;  %v75_v33 = vmul.f32 %v68_v23, %v59_v18  ;;  %v77_v34 = vmul.f32 %v68_v23, %v61_v22  ;;  %v429_v35 = vld [vmem:[#allocation6 + $0x30] sm:$0xff]  }
  0x31   :  { %v383_v44 = vld [vmem:[%s696_s4] ss:$0 sm:$0xff]  ;;  %s476_s4 = scalar_lea.vmem %s328_s18, 256 }
  0x32   :  { %390 = vmatpush3.bf16.msra.mxu0 %v421_v6  ;;  %v92_v31 = vadd.f32 %v88_v25, %v76_v28  ;;  %v94_v32 = vadd.f32 %v88_v25, %v78_v29  ;;  %v91_v38 = vadd.f32 %v84_v30, %v75_v33  ;;  %v93_v39 = vadd.f32 %v84_v30, %v77_v34  ;;  %v384_v47 = vld [vmem:[%s697_s5] ss:$0 sm:$0xff]  ;;  %p477_p2 = scmp.ne.s32.totalorder %s328_s18, %s476_s4  ;;  %p482_p4 = scmp.lt.s32.totalorder %s476_s4, %s476_s4 }
  0x33   :  { %391 = vmatprep.subr.bf16.mxu0 %v422_v7 }
  0x34   :  { %v96_v37 = vpack.c.bf16 %v94_v32, %v92_v31  ;;  %v95_v41 = vpack.c.bf16 %v93_v39, %v91_v38  ;;  %p483_p5 = por %p482_p4, %p481_p3 }
  0x36   :  { %392 = vmatpush3.bf16.msra.mxu0 %v423_v9  ;;  %257 = vmatprep.mubr.bf16.mxu0 %v96_v37  ;;  %p484_p6 = pnand %p483_p5, %p477_p2 }
  0x37   :  { %393 = vmatprep.subr.bf16.mxu0 %v424_v10 }
  0x3a   :  { %394 = vmatpush3.bf16.msra.mxu0 %v425_v12 }
  0x3b   :  { %395 = vmatprep.subr.bf16.mxu0 %v426_v14 }
  0x3e   :  { %396 = vmatpush3.bf16.msra.mxu0 %v427_v26 }
  0x3f   :  { %397 = vmatprep.subr.bf16.mxu0 %v428_v27 }
  0x42   :  { %398 = vmatpush3.bf16.msra.mxu0 %v429_v35 }
  0x43   :  { %399 = vmatprep.subr.bf16.mxu0 %v430_v36 }
  0x46   :  { %400 = vmatpush3.bf16.msra.mxu0 %v431_v40 }
  0x49   :  { %258 = vmatmul.mubr.bf16.vlgmr.msra.gmra.mrb[0].mxu0 %v95_v41 }
 0x11c   :  { %v401_v42 = vpop.f32.mrb[0].mxu0 }
 0x11d   :  { %v402_v43 = vpop.f32.mrb[1].mxu0 }
 0x11e   :  { %v403_v45 = vadd.f32 %v402_v43, %v401_v42  ;;  %v404_v46 = vpop.f32.mrb[2].mxu0 }
 0x11f   :  { %v405_v48 = vpop.f32.mrb[3].mxu0 }
 0x120   :  { %v279_v49 = vsel %vm273_vm0, %v403_v45, 0.0  ;;  %v309_v50 = vmul.f32 %v403_v45, %v383_v44  ;;  %v406_v51 = vadd.f32 %v405_v48, %v404_v46 }
 0x121   :  { %v282_v52 = vrot.slane %v279_v49, 4  ;;  %v288_v53 = vmul.f32 %v279_v49, %v279_v49 }
 0x122   :  { %v318_v54 = vadd.f32 %v384_v47, %v309_v50  ;;  %v310_v55 = vmul.f32 %v406_v51, %v383_v44 }
 0x123   :  { %v283_v56 = vadd.f32 %v282_v52, %v279_v49  ;;  %v291_v57 = vrot.slane %v288_v53, 4 }
 0x124   :  { %320 = vst [vmem:[#allocation8] sm:$0xff] %v318_v54  ;;  %v319_v58 = vadd.f32 %v384_v47, %v310_v55 }
 0x125   :  { %v284_v59 = vrot.slane %v283_v56, 2  ;;  %v292_v60 = vadd.f32 %v291_v57, %v288_v53 }
 0x126   :  { %321 = vst [vmem:[#allocation8 + $0x8] sm:$0xff] %v319_v58 }
 0x127   :  { %v293_v61 = vrot.slane %v292_v60, 2  ;;  %v285_v62 = vadd.f32 %v284_v59, %v283_v56 }
 0x128   :  { %487 = shalt.err (!%p484_p6)
}
 0x129   :  { %s488_s20 = scalar_lea.hbm %s698_s6, 256 }
 0x12a   :  { %p489_p7 = scmp.ne.s32.totalorder %s698_s6, %s488_s20  ;;  %p492_p8 = scmp.lt.u32.totalorder %s488_s20, %s698_s6 }
 0x12c   :  { %p494_p9 = pnand %p492_p8, %p489_p7 }
 0x12e   :  { %497 = shalt.err (!%p494_p9)
}
 0x12f   :  { %333 = dma.vmem_to_hbm [thread:$0]  %s328_s18, 256, %s698_s6, [#allocation5], %s551_s15, %s551_s15, %s552_s16   ;;  %v286_v63 = vrot.slane %v285_v62, 1  ;;  %v294_v0 = vadd.f32 %v293_v61, %v292_v60  ;;  %vm297_vm1 = vcmp.eq.s32.totalorder %v631_v8, 0 }
 0x130   :  { %s557_s27 = smov [#allocation9]   ;;  %s558_s0 = smov [#allocation11]  }
 0x131   :  { %s340_s29 = sshll.u32 %s557_s27, 4  ;;  %v287_v1 = vadd.f32 %v286_v63, %v285_v62  ;;  %v295_v2 = vrot.slane %v294_v0, 1  ;;  %s350_s28 = sshll.u32 %s558_s0, 4  ;;  %s341_s29 = int_to_ptr.vmem [resolvable:$true] %s340_s29  ;;  %s351_s28 = int_to_ptr.vmem [resolvable:$true] %s350_s28 }
 0x132   :  { %s498_s30 = scalar_lea.vmem %s341_s29, 128  ;;  %p503_p11 = scmp.lt.s32.totalorder %s341_s29, %s341_s29 }
 0x133   :  { %v298_v3 = vsel %vm297_vm1, %v287_v1, 0.0  ;;  %v296_v4 = vadd.f32 %v295_v2, %v294_v0  ;;  %p499_p10 = scmp.ne.s32.totalorder %s341_s29, %s498_s30  ;;  %p504_p12 = scmp.lt.s32.totalorder %s498_s30, %s498_s30 }
 0x134   :  { %299 = vst [vmem:[#allocation9] sm:$0xff] %v298_v3 }
 0x135   :  { %p505_p13 = por %p504_p12, %p503_p11 }
 0x137   :  { %p506_p0 = pnand %p505_p13, %p499_p10 }
 0x139   :  { %509 = shalt.err (!%p506_p0)
}
 0x13a   :  { %s510_s16 = scalar_lea.hbm %s699_s7, 128 }
 0x13b   :  { %p511_p1 = scmp.ne.s32.totalorder %s699_s7, %s510_s16  ;;  %p514_p2 = scmp.lt.u32.totalorder %s510_s16, %s699_s7 }
 0x13d   :  { %p516_p3 = pnand %p514_p2, %p511_p1 }
 0x13f   :  { %519 = shalt.err (!%p516_p3)
}
 0x140   :  { %343 = dma.vmem_to_hbm [thread:$0]  %s341_s29, 128, %s699_s7, [#allocation10]   ;;  %v300_v5 = vsel %vm297_vm1, %v296_v4, 0.0 }
 0x141   :  { %301 = vst [vmem:[#allocation11] sm:$0xff] %v300_v5  ;;  %s520_s3 = scalar_lea.vmem %s351_s28, 128  ;;  %p525_p5 = scmp.lt.s32.totalorder %s351_s28, %s351_s28 }
 0x142   :  { %p521_p4 = scmp.ne.s32.totalorder %s351_s28, %s520_s3  ;;  %p526_p6 = scmp.lt.s32.totalorder %s520_s3, %s520_s3 }
 0x144   :  { %p527_p7 = por %p526_p6, %p525_p5 }
 0x146   :  { %p528_p8 = pnand %p527_p7, %p521_p4 }
 0x148   :  { %531 = shalt.err (!%p528_p8)
}
 0x149   :  { %s532_s17 = scalar_lea.hbm %s700_s8, 128 }
 0x14a   :  { %p533_p9 = scmp.ne.s32.totalorder %s700_s8, %s532_s17  ;;  %p536_p10 = scmp.lt.u32.totalorder %s532_s17, %s700_s8 }
 0x14c   :  { %p538_p11 = pnand %p536_p10, %p533_p9 }
 0x14e   :  { %541 = shalt.err (!%p538_p11)
}
 0x14f   :  { %353 = dma.vmem_to_hbm [thread:$0]  %s351_s28, 128, %s700_s8, [#allocation10]  }
 0x150   :  { %546 = dma.done.wait [#allocation5], 256  }
 0x151   :  { %547 = vsyncadd [#allocation5], 4294967040 }
 0x152   :  { %548 = dma.done.wait [#allocation10], 256  }
 0x153   :  { %549 = vsyncadd [#allocation10], 4294967040 }
 0x154   :  { %363 = vsyncpa [#allocation4], 1 }
 0x155   :  { %364 = vsyncpa [#allocation7], 1 }
 0x156   :  { %365 = vsyncpa [#allocation5], 1 }
 0x157   :  { %366 = vsyncpa [#allocation10], 1 }

</bundles_post_ra>
